<compile_context>
chip_gen: v6e
topology: v6e:2x2x1
jax: 0.10.0
libtpu: 0.0.40
codegen_flags: <defaults>
</compile_context>

<pallas_src>
import jax
import jax.numpy as jnp
from jax.experimental import pallas as pl
from jax.experimental.pallas import tpu as pltpu


def _pick_lane_width(total: int) -> int:
    """Pick a lane-dense last dim (large multiple of 128) that divides total."""
    for c in (1024, 2048, 512, 4096, 256, 8192, 128):
        if total % c == 0:
            return c
    return 0  # no multiple-of-128 factorization available


def view_pallas(x: jax.Array, o: int) -> jax.Array:
    """Equivalent of torch.Tensor.view(-1, o); the data copy is Pallas DMAs."""
    total = x.size
    if total % o != 0:
        raise ValueError(f"cannot view array of {total} elements as (-1, {o})")
    n_rows = total // o
    if total == 0:
        return jnp.reshape(x, (n_rows, o))  # nothing to copy (avoids 0-size grid)

    itemsize = jnp.dtype(x.dtype).itemsize

    # Factor the copy as (R, C) with C a large multiple of 128 when possible
    # (lane-dense contiguous slabs); the logical shape is restored afterwards
    # with a metadata-only reshape.
    C = _pick_lane_width(total)
    if C == 0:
        C = o                       # always-legal fallback (total % o == 0)
    R = total // C

    # >= 2 grid steps (when R allows) so v7x megacore can shard the DMA issue
    # across both TensorCores; v5e/v6e (single TC) are unaffected.
    G = 2 if R >= 2 else 1
    rows_per_step = R // G
    rem_rows = R - G * rows_per_step          # 0 or 1 leftover row (G <= 2)

    # 4-8 concurrent DMAs per grid step: start all, then wait all.
    n_chunks = min(8, rows_per_step)
    base, extra = divmod(rows_per_step, n_chunks)
    chunk_sizes = [base + (1 if k < extra else 0) for k in range(n_chunks)]
    chunk_offs, off = [], 0
    for s in chunk_sizes:
        chunk_offs.append(off)
        off += s
    n_sems = n_chunks + (1 if rem_rows else 0)

    def kernel(x_hbm, o_hbm, sems):
        i = pl.program_id(0)
        row0 = i * rows_per_step
        copies = []
        # Start all chunk DMAs (direct HBM->HBM, no VMEM staging).
        for k in range(n_chunks):
            start = row0 + chunk_offs[k]
            cp = pltpu.make_async_copy(
                x_hbm.at[pl.ds(start, chunk_sizes[k]), :],
                o_hbm.at[pl.ds(start, chunk_sizes[k]), :],
                sems.at[k],
            )
            cp.start()
            copies.append(cp)
        # Ragged tail rows (static size), handled once on the last step only.
        if rem_rows:
            @pl.when(i == G - 1)
            def _():
                tail = pltpu.make_async_copy(
                    x_hbm.at[pl.ds(G * rows_per_step, rem_rows), :],
                    o_hbm.at[pl.ds(G * rows_per_step, rem_rows), :],
                    sems.at[n_chunks],
                )
                tail.start()
                tail.wait()
        # Wait for all in-flight chunk DMAs.
        for cp in copies:
            cp.wait()

    # Metadata-only reshape of a contiguous (row-major) array.
    x2d = x.reshape(R, C)

    # TODO(synk): input_output_aliases={0: 0} would make this a true in-place
    # view (no second HBM buffer) but requires donation at a jit boundary and
    # would turn every DMA into a same-address self-copy; left out for safety.
    out2d = pl.pallas_call(
        kernel,
        out_shape=jax.ShapeDtypeStruct((R, C), x.dtype),
        grid_spec=pltpu.PrefetchScalarGridSpec(
            num_scalar_prefetch=0,
            grid=(G,),
            in_specs=[pl.BlockSpec(memory_space=pl.ANY)],
            out_specs=pl.BlockSpec(memory_space=pl.ANY),
            scratch_shapes=[pltpu.SemaphoreType.DMA((n_sems,))],
        ),
        compiler_params=pltpu.CompilerParams(
            dimension_semantics=("parallel",),   # shards grid across TCs on v7x
        ),
        cost_estimate=pl.CostEstimate(
            flops=0, transcendentals=0, bytes_accessed=2 * total * itemsize),
    )(x2d)

    # Final logical shape: metadata-only reshape.
    return out2d.reshape(n_rows, o)


if __name__ == "__main__":
    key = jax.random.PRNGKey(0)

    # Small NCHW input: batch=2, channels=4, spatial=16x16 -> 2048 elements.
    # o = 128 -> logical output shape (16, 128).
    x = jax.random.normal(key, (2, 4, 16, 16), dtype=jnp.float32)
    o = 128

    y = view_pallas(x, o)
    y = jax.block_until_ready(y)

    # Reference check against plain JAX reshape (== torch .view semantics).
    ref = x.reshape(-1, o)
    assert y.shape == ref.shape, (y.shape, ref.shape)
    assert y.dtype == ref.dtype
    assert bool(jnp.array_equal(y, ref))

    print("KERNEL_OK")
</pallas_src>

<mosaic_0001>
module attributes {stable_mosaic.version = 11 : i64} {
  func.func @kernel(%arg0: i32, %arg1: memref<2x1024xf32, #tpu.memory_space<any>>, %arg2: memref<2x1024xf32, #tpu.memory_space<any>>, %arg3: memref<1x!tpu.dma_semaphore, #tpu.memory_space<semaphore_mem>>) attributes {dimension_semantics = [#tpu.dimension_semantics<parallel>], iteration_bounds = array<i64: 2>, scalar_prefetch = 0 : i64, scratch_operands = 1 : i64, tpu.core_type = #tpu.core_type<tc>, window_params = [{}, {}]} {
    %c1_i32 = arith.constant 1 : i32
    %0 = arith.muli %arg0, %c1_i32 : i32
    %c0_i32 = arith.constant 0 : i32
    %1 = arith.addi %0, %c0_i32 : i32
    %c0_i32_0 = arith.constant 0 : i32
    %c0_i32_1 = arith.constant 0 : i32
    %2 = tpu.memref_slice %arg1[%1, %c0_i32_1] : memref<2x1024xf32, #tpu.memory_space<any>> -> memref<1x1024xf32, #tpu.memory_space<any>>
    %c0_i32_2 = arith.constant 0 : i32
    %3 = tpu.memref_slice %arg2[%1, %c0_i32_2] : memref<2x1024xf32, #tpu.memory_space<any>> -> memref<1x1024xf32, #tpu.memory_space<any>>
    %4 = tpu.memref_slice %arg3[%c0_i32_0] : memref<1x!tpu.dma_semaphore, #tpu.memory_space<semaphore_mem>> -> memref<1x!tpu.dma_semaphore, #tpu.memory_space<semaphore_mem>>
    %5 = tpu.memref_squeeze %4 : memref<1x!tpu.dma_semaphore, #tpu.memory_space<semaphore_mem>> -> memref<!tpu.dma_semaphore, #tpu.memory_space<semaphore_mem>>
    tpu.enqueue_dma source(%2 : memref<1x1024xf32, #tpu.memory_space<any>>) target(%3 : memref<1x1024xf32, #tpu.memory_space<any>>) target_semaphore(%5 : memref<!tpu.dma_semaphore, #tpu.memory_space<semaphore_mem>>)
    %c0_i32_3 = arith.constant 0 : i32
    %c0_i32_4 = arith.constant 0 : i32
    %6 = tpu.memref_slice %arg1[%1, %c0_i32_4] : memref<2x1024xf32, #tpu.memory_space<any>> -> memref<1x1024xf32, #tpu.memory_space<any>>
    %c0_i32_5 = arith.constant 0 : i32
    %7 = tpu.memref_slice %arg2[%1, %c0_i32_5] : memref<2x1024xf32, #tpu.memory_space<any>> -> memref<1x1024xf32, #tpu.memory_space<any>>
    %8 = tpu.memref_slice %arg3[%c0_i32_3] : memref<1x!tpu.dma_semaphore, #tpu.memory_space<semaphore_mem>> -> memref<1x!tpu.dma_semaphore, #tpu.memory_space<semaphore_mem>>
    %9 = tpu.memref_squeeze %8 : memref<1x!tpu.dma_semaphore, #tpu.memory_space<semaphore_mem>> -> memref<!tpu.dma_semaphore, #tpu.memory_space<semaphore_mem>>
    tpu.wait_dma2 semaphore(%9 : memref<!tpu.dma_semaphore, #tpu.memory_space<semaphore_mem>>) src(%6 : memref<1x1024xf32, #tpu.memory_space<any>>) dst(%7 : memref<1x1024xf32, #tpu.memory_space<any>>)
    return
  }
}

</mosaic_0001>

<bundles_post_ra>
// kernel: tpu_custom_call.1
= control target key start
LH: loop header
LB: loop body
LE: loop exit
PB: predicated region body
PF: predicated region fallthrough
CT: control target
= control target key end

     0   :  { %s79_s6 = smov 0   ;;  %s104_s0 = inlined_call_operand.hbm [shape: f32[2,1024], index: 0, kind: input, shape index: {}]   ;;  %s105_s1 = inlined_call_operand.hbm [shape: f32[2,1024], index: 1, kind: output, shape index: {}]  }
   0x1 LB: > { %s13_s7 = sshrl.u32 %s81_s6, 1  ;;  %s14_s8 = sand.u32 1, %s81_s6   ;;  %s81_s6 = sphi %s79_s6, %s11_s6  }
   0x2   : > { %s56_s9 = sshll.u32 %s13_s7, 4  ;;  %s83_s11 = smov 32  }
   0x3   : > { %s16_s10 = sadd.s32 %s56_s9, %s14_s8  ;;  %27 = sst [smem:[#allocation4]] %s83_s11 }
   0x4   : > { %s57_s12 = sshll.u32 %s16_s10, 4  ;;  %29 = sst [smem:[#allocation4 + $0x1]] %s83_s11 }
   0x5   : > { %s18_s15 = scalar_lea.hbm %s104_s0, %s57_s12  ;;  %s20_s18 = scalar_lea.hbm %s105_s1, %s57_s12 }
   0x6   : > { %s84_s19 = smov 1   ;;  %s85_s20 = smov [#allocation2]  }
   0x7   : > { %31 = sst [smem:[#allocation4 + $0x2]] %s84_s19  ;;  %s86_s21 = smov 131072  }
   0x8   : > { %s87_s22 = smov 0  }
   0x9   : > { %33 = dma.general %s18_s15, 128, %s20_s18, %s85_s20, %s86_s21, [#allocation4], %s87_s22, 0  }
   0xa   : > { %77 = dma.done.wait [#allocation2], 128 }
   0xb   : > { %78 = vsyncadd [#allocation2], 4294967168  ;;  %s11_s6 = sadd.s32 1, %s81_s6  }
   0xc   : > { %p8_p0 = scmp.ge.s32.totalorder %s11_s6, 2  }
   0xe   :  { %10 = sbr.rel (!%p8_p0) target bundleno = 1 (0x1), region = 23 }
  0x13   :  { %37 = vsyncmov [#allocation2] }
  0x16   :  { %s38_s23 = vpop.sfrf %37 }
  0x17   :  { %p59_p1 = scmp.ne.s32.totalorder %s38_s23, 0 }
  0x19   :  { %42 = shalt.err (%p59_p1)  }

</bundles_post_ra>
